<compile_context>
chip_gen: v7x
topology: tpu7x:2x2x1
jax: 0.10.0
libtpu: 0.0.40
codegen_flags: <defaults>
</compile_context>

<pallas_src>
import jax
import jax.numpy as jnp
from jax.experimental import pallas as pl
from jax.experimental.pallas import tpu as pltpu


def ar_kernel(x_ref, w_ref, b_ref, o_ref):
    # x_ref : (TN, W, TM)   input window block, feature tile on the lane axis
    # w_ref : (W, TM)       AR weights for this feature tile (reused across N steps)
    # b_ref : (1, TM)       bias for this feature tile
    # o_ref : (TN, H, TM)   output block, horizon broadcast along sublanes
    x = x_ref[...]                                           # (TN, W, TM)
    w = w_ref[...]                                           # (W, TM)
    # Per-feature weighted sum over the window axis: VPU multiply + sublane reduce.
    y = jnp.sum(x * w[None, :, :], axis=1) + b_ref[...]      # (TN, TM)
    y = y.astype(o_ref.dtype)
    # Horizon broadcast: unrolled per-row stores (no (TN, H, TM) vreg temporary).
    for t in range(o_ref.shape[1]):
        o_ref[:, t, :] = y


def _choose_tiles(N, W, M, H, *, data_budget_bytes=16 * 1024 * 1024):
    """Pick (tile_n, tile_m): lane-dense tile_m, then the largest batch tile whose
    double-buffered input+output blocks fit the VMEM data budget."""
    if M % 128 == 0:
        tile_m = 128
        for cand in (512, 384, 256, 128):
            if M % cand == 0:
                tile_m = cand
                break
    else:
        # Block dim equal to the full array dim is always allowed (lane padding only).
        tile_m = M
    # Per batch row, per grid step: x block (W*tile_m) + out block (H*tile_m),
    # each double-buffered by the pipeline, in f32.
    bytes_per_batch_row = 2 * (W + H) * tile_m * 4
    max_tile_n = max(1, data_budget_bytes // bytes_per_batch_row)
    tile_n = min(N, max_tile_n)
    while N % tile_n:
        tile_n -= 1
    return tile_n, tile_m


def ar_forward(x, weight, bias, horizon, *, tile_n=None, tile_m=None):
    """x: (N, W, M); weight: (W, M); bias: (M,). Returns ((N, horizon, M), None)."""
    N, W, M = x.shape
    assert weight.shape == (W, M)
    assert bias.shape == (M,)
    H = int(horizon)

    auto_n, auto_m = _choose_tiles(N, W, M, H)
    tile_n = auto_n if tile_n is None else tile_n
    tile_m = auto_m if tile_m is None else tile_m
    assert N % tile_n == 0 and M % tile_m == 0

    x = x.astype(jnp.float32)
    w2 = weight.astype(jnp.float32)
    b2 = bias.reshape(1, M).astype(jnp.float32)

    # Grid: feature tiles outer, batch tiles inner. weight/bias index_maps ignore the
    # inner (batch) axis, so their blocks are not re-DMA'd between consecutive steps.
    grid = (M // tile_m, N // tile_n)

    cost = pl.CostEstimate(
        flops=2 * N * W * M,
        transcendentals=0,
        bytes_accessed=4 * (N * W * M + W * M + M + N * H * M),
    )

    out = pl.pallas_call(
        ar_kernel,
        out_shape=jax.ShapeDtypeStruct((N, H, M), jnp.float32),
        grid=grid,
        in_specs=[
            pl.BlockSpec((tile_n, W, tile_m), lambda j, i: (i, 0, j)),
            pl.BlockSpec((W, tile_m), lambda j, i: (0, j)),
            pl.BlockSpec((1, tile_m), lambda j, i: (0, j)),
        ],
        out_specs=pl.BlockSpec((tile_n, H, tile_m), lambda j, i: (i, 0, j)),
        compiler_params=pltpu.CompilerParams(
            dimension_semantics=("parallel", "parallel"),
            vmem_limit_bytes=32 * 1024 * 1024,
        ),
        cost_estimate=cost,
    )(x, w2, b2)

    # The PyTorch module returns a tuple (output, None).
    return out, None


def ar_reference(x, weight, bias, horizon):
    """Pure-JAX replica of AR.forward (output_fun is always None in the module)."""
    y = jnp.sum(x * weight[None, :, :], axis=1) + bias[None, :]
    return jnp.broadcast_to(y[:, None, :], (x.shape[0], horizon, x.shape[2]))


if __name__ == "__main__":
    # Small shapes consistent with the module: x is (batch, window, m);
    # weight (window, m); bias (m,); horizon h for the expanded output.
    N, W, M, H = 16, 8, 256, 12

    key = jax.random.PRNGKey(0)
    kx, kw, kb = jax.random.split(key, 3)

    x = jax.random.normal(kx, (N, W, M), dtype=jnp.float32)
    # Deterministic stand-ins for xavier_normal_(weight) / zeros(bias) init
    # (bias made nonzero here to exercise the add path).
    weight = jax.random.normal(kw, (W, M), dtype=jnp.float32) * 0.1
    bias = jax.random.normal(kb, (M,), dtype=jnp.float32) * 0.1

    ref = ar_reference(x, weight, bias, H)

    # 1) Default, budget-derived tiling (single-step grid at this demo size).
    out, aux = ar_forward(x, weight, bias, H)
    out = jax.block_until_ready(out)
    assert out.shape == (N, H, M), out.shape
    assert aux is None
    assert jnp.allclose(out, ref, rtol=1e-5, atol=1e-5), (
        float(jnp.max(jnp.abs(out - ref))))

    # 2) Forced multi-step grid (2 feature tiles x 4 batch tiles) to exercise the
    #    index maps / pipelining path.
    out2, _ = ar_forward(x, weight, bias, H, tile_n=4, tile_m=128)
    out2 = jax.block_until_ready(out2)
    assert jnp.allclose(out2, ref, rtol=1e-5, atol=1e-5), (
        float(jnp.max(jnp.abs(out2 - ref))))

    print("KERNEL_OK")
</pallas_src>

<mosaic_0001>
module attributes {stable_mosaic.version = 11 : i64} {
  func.func @ar_kernel(%arg0: i32, %arg1: i32, %arg2: memref<16x8x256xf32, #tpu.memory_space<vmem>>, %arg3: memref<8x256xf32, #tpu.memory_space<vmem>>, %arg4: memref<1x256xf32, #tpu.memory_space<vmem>>, %arg5: memref<16x12x256xf32, #tpu.memory_space<vmem>>) attributes {dimension_semantics = [#tpu.dimension_semantics<parallel>, #tpu.dimension_semantics<parallel>], iteration_bounds = array<i64: 1, 1>, scalar_prefetch = 0 : i64, scratch_operands = 0 : i64, tpu.core_type = #tpu.core_type<tc>, window_params = [{transform_indices = @transform_0, window_bounds = array<i64: 16, 8, 256>}, {transform_indices = @transform_1, window_bounds = array<i64: 8, 256>}, {transform_indices = @transform_2, window_bounds = array<i64: 1, 256>}, {transform_indices = @transform_3, window_bounds = array<i64: 16, 12, 256>}]} {
    %c0 = arith.constant 0 : index
    %c0_0 = arith.constant 0 : index
    %c0_1 = arith.constant 0 : index
    %0 = vector.load %arg2[%c0, %c0_0, %c0_1] : memref<16x8x256xf32, #tpu.memory_space<vmem>>, vector<16x8x256xf32>
    %c0_2 = arith.constant 0 : index
    %c0_3 = arith.constant 0 : index
    %1 = vector.load %arg3[%c0_2, %c0_3] : memref<8x256xf32, #tpu.memory_space<vmem>>, vector<8x256xf32>
    %2 = vector.shape_cast %1 : vector<8x256xf32> to vector<1x8x256xf32>
    %3 = vector.broadcast %2 : vector<1x8x256xf32> to vector<16x8x256xf32>
    %4 = arith.mulf %0, %3 : vector<16x8x256xf32>
    %cst = arith.constant dense<0.000000e+00> : vector<16x256xf32>
    %5 = vector.multi_reduction <add>, %4, %cst [1] : vector<16x8x256xf32> to vector<16x256xf32>
    %c0_4 = arith.constant 0 : index
    %c0_5 = arith.constant 0 : index
    %6 = vector.load %arg4[%c0_4, %c0_5] : memref<1x256xf32, #tpu.memory_space<vmem>>, vector<1x256xf32>
    %7 = vector.broadcast %6 : vector<1x256xf32> to vector<16x256xf32>
    %8 = arith.addf %5, %7 : vector<16x256xf32>
    %c0_6 = arith.constant 0 : index
    %c0_7 = arith.constant 0 : index
    %c0_8 = arith.constant 0 : index
    %9 = vector.load %arg5[%c0_6, %c0_7, %c0_8] : memref<16x12x256xf32, #tpu.memory_space<vmem>>, vector<16x1x256xf32>
    %10 = vector.shape_cast %9 : vector<16x1x256xf32> to vector<16x256xf32>
    %11 = vector.shape_cast %8 : vector<16x256xf32> to vector<16x1x256xf32>
    tpu.vector_store %arg5[%c0_6, %c0_7, %c0_8], %11 {strides = array<i32>} : memref<16x12x256xf32, #tpu.memory_space<vmem>>, vector<16x1x256xf32>,
    %c0_9 = arith.constant 0 : index
    %c1 = arith.constant 1 : index
    %c0_10 = arith.constant 0 : index
    %12 = vector.load %arg5[%c0_9, %c1, %c0_10] : memref<16x12x256xf32, #tpu.memory_space<vmem>>, vector<16x1x256xf32>
    %13 = vector.shape_cast %12 : vector<16x1x256xf32> to vector<16x256xf32>
    %14 = vector.shape_cast %8 : vector<16x256xf32> to vector<16x1x256xf32>
    tpu.vector_store %arg5[%c0_9, %c1, %c0_10], %14 {strides = array<i32>} : memref<16x12x256xf32, #tpu.memory_space<vmem>>, vector<16x1x256xf32>,
    %c0_11 = arith.constant 0 : index
    %c2 = arith.constant 2 : index
    %c0_12 = arith.constant 0 : index
    %15 = vector.load %arg5[%c0_11, %c2, %c0_12] : memref<16x12x256xf32, #tpu.memory_space<vmem>>, vector<16x1x256xf32>
    %16 = vector.shape_cast %15 : vector<16x1x256xf32> to vector<16x256xf32>
    %17 = vector.shape_cast %8 : vector<16x256xf32> to vector<16x1x256xf32>
    tpu.vector_store %arg5[%c0_11, %c2, %c0_12], %17 {strides = array<i32>} : memref<16x12x256xf32, #tpu.memory_space<vmem>>, vector<16x1x256xf32>,
    %c0_13 = arith.constant 0 : index
    %c3 = arith.constant 3 : index
    %c0_14 = arith.constant 0 : index
    %18 = vector.load %arg5[%c0_13, %c3, %c0_14] : memref<16x12x256xf32, #tpu.memory_space<vmem>>, vector<16x1x256xf32>
    %19 = vector.shape_cast %18 : vector<16x1x256xf32> to vector<16x256xf32>
    %20 = vector.shape_cast %8 : vector<16x256xf32> to vector<16x1x256xf32>
    tpu.vector_store %arg5[%c0_13, %c3, %c0_14], %20 {strides = array<i32>} : memref<16x12x256xf32, #tpu.memory_space<vmem>>, vector<16x1x256xf32>,
    %c0_15 = arith.constant 0 : index
    %c4 = arith.constant 4 : index
    %c0_16 = arith.constant 0 : index
    %21 = vector.load %arg5[%c0_15, %c4, %c0_16] : memref<16x12x256xf32, #tpu.memory_space<vmem>>, vector<16x1x256xf32>
    %22 = vector.shape_cast %21 : vector<16x1x256xf32> to vector<16x256xf32>
    %23 = vector.shape_cast %8 : vector<16x256xf32> to vector<16x1x256xf32>
    tpu.vector_store %arg5[%c0_15, %c4, %c0_16], %23 {strides = array<i32>} : memref<16x12x256xf32, #tpu.memory_space<vmem>>, vector<16x1x256xf32>,
    %c0_17 = arith.constant 0 : index
    %c5 = arith.constant 5 : index
    %c0_18 = arith.constant 0 : index
    %24 = vector.load %arg5[%c0_17, %c5, %c0_18] : memref<16x12x256xf32, #tpu.memory_space<vmem>>, vector<16x1x256xf32>
    %25 = vector.shape_cast %24 : vector<16x1x256xf32> to vector<16x256xf32>
    %26 = vector.shape_cast %8 : vector<16x256xf32> to vector<16x1x256xf32>
    tpu.vector_store %arg5[%c0_17, %c5, %c0_18], %26 {strides = array<i32>} : memref<16x12x256xf32, #tpu.memory_space<vmem>>, vector<16x1x256xf32>,
    %c0_19 = arith.constant 0 : index
    %c6 = arith.constant 6 : index
    %c0_20 = arith.constant 0 : index
    %27 = vector.load %arg5[%c0_19, %c6, %c0_20] : memref<16x12x256xf32, #tpu.memory_space<vmem>>, vector<16x1x256xf32>
    %28 = vector.shape_cast %27 : vector<16x1x256xf32> to vector<16x256xf32>
    %29 = vector.shape_cast %8 : vector<16x256xf32> to vector<16x1x256xf32>
    tpu.vector_store %arg5[%c0_19, %c6, %c0_20], %29 {strides = array<i32>} : memref<16x12x256xf32, #tpu.memory_space<vmem>>, vector<16x1x256xf32>,
    %c0_21 = arith.constant 0 : index
    %c7 = arith.constant 7 : index
    %c0_22 = arith.constant 0 : index
    %30 = vector.load %arg5[%c0_21, %c7, %c0_22] : memref<16x12x256xf32, #tpu.memory_space<vmem>>, vector<16x1x256xf32>
    %31 = vector.shape_cast %30 : vector<16x1x256xf32> to vector<16x256xf32>
    %32 = vector.shape_cast %8 : vector<16x256xf32> to vector<16x1x256xf32>
    tpu.vector_store %arg5[%c0_21, %c7, %c0_22], %32 {strides = array<i32>} : memref<16x12x256xf32, #tpu.memory_space<vmem>>, vector<16x1x256xf32>,
    %c0_23 = arith.constant 0 : index
    %c8 = arith.constant 8 : index
    %c0_24 = arith.constant 0 : index
    %33 = vector.load %arg5[%c0_23, %c8, %c0_24] : memref<16x12x256xf32, #tpu.memory_space<vmem>>, vector<16x1x256xf32>
    %34 = vector.shape_cast %33 : vector<16x1x256xf32> to vector<16x256xf32>
    %35 = vector.shape_cast %8 : vector<16x256xf32> to vector<16x1x256xf32>
    tpu.vector_store %arg5[%c0_23, %c8, %c0_24], %35 {strides = array<i32>} : memref<16x12x256xf32, #tpu.memory_space<vmem>>, vector<16x1x256xf32>,
    %c0_25 = arith.constant 0 : index
    %c9 = arith.constant 9 : index
    %c0_26 = arith.constant 0 : index
    %36 = vector.load %arg5[%c0_25, %c9, %c0_26] : memref<16x12x256xf32, #tpu.memory_space<vmem>>, vector<16x1x256xf32>
    %37 = vector.shape_cast %36 : vector<16x1x256xf32> to vector<16x256xf32>
    %38 = vector.shape_cast %8 : vector<16x256xf32> to vector<16x1x256xf32>
    tpu.vector_store %arg5[%c0_25, %c9, %c0_26], %38 {strides = array<i32>} : memref<16x12x256xf32, #tpu.memory_space<vmem>>, vector<16x1x256xf32>,
    %c0_27 = arith.constant 0 : index
    %c10 = arith.constant 10 : index
    %c0_28 = arith.constant 0 : index
    %39 = vector.load %arg5[%c0_27, %c10, %c0_28] : memref<16x12x256xf32, #tpu.memory_space<vmem>>, vector<16x1x256xf32>
    %40 = vector.shape_cast %39 : vector<16x1x256xf32> to vector<16x256xf32>
    %41 = vector.shape_cast %8 : vector<16x256xf32> to vector<16x1x256xf32>
    tpu.vector_store %arg5[%c0_27, %c10, %c0_28], %41 {strides = array<i32>} : memref<16x12x256xf32, #tpu.memory_space<vmem>>, vector<16x1x256xf32>,
    %c0_29 = arith.constant 0 : index
    %c11 = arith.constant 11 : index
    %c0_30 = arith.constant 0 : index
    %42 = vector.load %arg5[%c0_29, %c11, %c0_30] : memref<16x12x256xf32, #tpu.memory_space<vmem>>, vector<16x1x256xf32>
    %43 = vector.shape_cast %42 : vector<16x1x256xf32> to vector<16x256xf32>
    %44 = vector.shape_cast %8 : vector<16x256xf32> to vector<16x1x256xf32>
    tpu.vector_store %arg5[%c0_29, %c11, %c0_30], %44 {strides = array<i32>} : memref<16x12x256xf32, #tpu.memory_space<vmem>>, vector<16x1x256xf32>,
    return
  }
  func.func @transform_0(%arg0: i32, %arg1: i32) -> (i32, i32, i32) {
    %c0_i32 = arith.constant 0 : i32
    %c0_i32_0 = arith.constant 0 : i32
    return %arg1, %c0_i32, %arg0 : i32, i32, i32
  }
  func.func @transform_1(%arg0: i32, %arg1: i32) -> (i32, i32) {
    %c0_i32 = arith.constant 0 : i32
    %c0_i32_0 = arith.constant 0 : i32
    return %c0_i32, %arg0 : i32, i32
  }
  func.func @transform_2(%arg0: i32, %arg1: i32) -> (i32, i32) {
    %c0_i32 = arith.constant 0 : i32
    %c0_i32_0 = arith.constant 0 : i32
    return %c0_i32, %arg0 : i32, i32
  }
  func.func @transform_3(%arg0: i32, %arg1: i32) -> (i32, i32, i32) {
    %c0_i32 = arith.constant 0 : i32
    %c0_i32_0 = arith.constant 0 : i32
    return %arg1, %c0_i32, %arg0 : i32, i32, i32
  }
}

</mosaic_0001>

<bundles_post_ra>
// kernel: tpu_custom_call.1
= control target key start
LH: loop header
LB: loop body
LE: loop exit
PB: predicated region body
PF: predicated region fallthrough
CT: control target
= control target key end

     0   :  { %8 = vsyncpa [#allocation3], 0  ;;  %s2591_s0 = inlined_call_operand.hbm [shape: f32[16,8,256], index: 0, kind: input, shape index: {}]   ;;  %s2592_s1 = inlined_call_operand.hbm [shape: f32[8,256], index: 1, kind: input, shape index: {}]   ;;  %s2593_s2 = inlined_call_operand.vmem [shape: f32[1,256], index: 2, kind: input, shape index: {}]   ;;  %s2594_s3 = inlined_call_operand.vmem [shape: f32[16,12,256], index: 3, kind: output, shape index: {}]  }
   0x1   :  { %9 = vsyncpa [#allocation5], 0  ;;  %s1459_s12 = smov [#allocation2]   ;;  %s1411_s16 = scalar_lea.hbm %s2591_s0, 4096 }
   0x2   :  { %s15_s13 = sshll.u32 %s1459_s12, 4  ;;  %p1412_p0 = scmp.ne.s32.totalorder %s2591_s0, %s1411_s16  ;;  %s16_s13 = int_to_ptr.vmem [resolvable:$true] %s15_s13 }
   0x3   :  { %p1415_p1 = scmp.lt.u32.totalorder %s1411_s16, %s2591_s0 }
   0x5   :  { %p1417_p2 = pnand %p1415_p1, %p1412_p0 }
   0x7   :  { %1420 = shalt.err (!%p1417_p2)
}
   0x8   :  { %s1421_s21 = scalar_lea.vmem %s16_s13, 4096  ;;  %p1426_p4 = scmp.lt.s32.totalorder %s16_s13, %s16_s13 }
   0x9   :  { %p1422_p3 = scmp.ne.s32.totalorder %s16_s13, %s1421_s21  ;;  %p1427_p5 = scmp.lt.s32.totalorder %s1421_s21, %s1421_s21 }
   0xb   :  { %p1428_p6 = por %p1427_p5, %p1426_p4 }
   0xd   :  { %p1429_p7 = pnand %p1428_p6, %p1422_p3 }
   0xf   :  { %1432 = shalt.err (!%p1429_p7)
}
  0x10   :  { %s1460_s22 = smov 256   ;;  %s1461_s23 = smov 16  }
  0x11   :  { %21 = dma.hbm_to_vmem [thread:$0]  %s2591_s0, 4096, %s16_s13, [#allocation3], %s1460_s22, %s1460_s22, %s1461_s23  }
  0x12   :  { %s1462_s26 = smov [#allocation4]   ;;  %s1433_s30 = scalar_lea.hbm %s2592_s1, 256 }
  0x13   :  { %s28_s27 = sshll.u32 %s1462_s26, 4  ;;  %p1434_p8 = scmp.ne.s32.totalorder %s2592_s1, %s1433_s30  ;;  %s29_s27 = int_to_ptr.vmem [resolvable:$true] %s28_s27 }
  0x14   :  { %p1437_p9 = scmp.lt.u32.totalorder %s1433_s30, %s2592_s1 }
  0x16   :  { %p1439_p10 = pnand %p1437_p9, %p1434_p8 }
  0x18   :  { %1442 = shalt.err (!%p1439_p10)
}
  0x19   :  { %s1443_s8 = scalar_lea.vmem %s29_s27, 256  ;;  %p1448_p12 = scmp.lt.s32.totalorder %s29_s27, %s29_s27 }
  0x1a   :  { %p1444_p11 = scmp.ne.s32.totalorder %s29_s27, %s1443_s8  ;;  %p1449_p13 = scmp.lt.s32.totalorder %s1443_s8, %s1443_s8 }
  0x1c   :  { %p1450_p0 = por %p1449_p13, %p1448_p12 }
  0x1e   :  { %p1451_p1 = pnand %p1450_p0, %p1444_p11 }
  0x20   :  { %1454 = shalt.err (!%p1451_p1)
}
  0x21   :  { %31 = dma.hbm_to_vmem [thread:$0]  %s2592_s1, 256, %s29_s27, [#allocation5]  }
  0x22   :  { %1455 = dma.done.wait [#allocation3], 4096  }
  0x23   :  { %1456 = vsyncadd [#allocation3], 4294963200 }
  0x24   :  { %1457 = dma.done.wait [#allocation5], 256  }
  0x25   :  { %1458 = vsyncadd [#allocation5], 4294967040  ;;  %v300_v0 = vlaneseq  ;;  %v1463_v1 = vmov 1966171168   ;;  %v40_v7 = vld [vmem:[#allocation2] sm:$0xff]  ;;  %v41_v8 = vld [vmem:[#allocation2 + $0x8] sm:$0xff] }
  0x26   :  { %v376_v2 = vunpack.c.l.s4 %v1463_v1  ;;  %v1509_v9 = vld [vmem:[#allocation4] sm:$0xff]  ;;  %v1511_v10 = vld [vmem:[#allocation4 + $0x8] sm:$0xff]  ;;  %v42_v14 = vld [vmem:[#allocation2 + $0x10] sm:$0xff] }
  0x27   :  { %v301_v3 = vshrl.u32 %v300_v0, 7  ;;  %v74_v11 = vmul.f32 %v1509_v9, %v40_v7  ;;  %v298_v12 = vld [vmem:[%s2593_s2] sm:$0x3]  ;;  %v75_v15 = vmul.f32 %v1511_v10, %v41_v8  ;;  %v43_v18 = vld [vmem:[#allocation2 + $0x18] sm:$0xff]  ;;  %v76_v19 = vmul.f32 %v1509_v9, %v42_v14  ;;  %v45_v21 = vld [vmem:[#allocation2 + $0x28] sm:$0xff] }
  0x28   :  { %v377_v4 = vunpack.c.0.s8 %v376_v2  ;;  %v44_v20 = vld [vmem:[#allocation2 + $0x20] sm:$0xff]  ;;  %v77_v23 = vmul.f32 %v1511_v10, %v43_v18  ;;  %v79_v25 = vmul.f32 %v1511_v10, %v45_v21  ;;  %v46_v26 = vld [vmem:[#allocation2 + $0x30] sm:$0xff]  ;;  %v47_v27 = vld [vmem:[#allocation2 + $0x38] sm:$0xff]  ;;  %vm1531_vm0 = vcmp.lt.s32.totalorder %v300_v0, 256 }
  0x29   :  { %v302_v5 = vsub.s32 0, %v301_v3  ;;  %v306_v6 = vsub.s32 1, %v301_v3  ;;  %v106_v22 = vrot.slane %v74_v11, 4  ;;  %v78_v24 = vmul.f32 %v1509_v9, %v44_v20  ;;  %v49_v20 = vld [vmem:[#allocation2 + $0x48] sm:$0xff] }
  0x2a   :  { %v1517_v13 = vsub.s32 %v377_v4, %v301_v3  ;;  %v112_v28 = vrot.slane %v75_v15, 4  ;;  %v118_v29 = vrot.slane %v76_v19, 4  ;;  %v80_v30 = vmul.f32 %v1509_v9, %v46_v26 }
  0x2b   :  { %v1520_v16 = vrot.slane %v298_v12, %v302_v5  ;;  %v1522_v17 = vrot.slane %v298_v12, %v306_v6  ;;  %v81_v31 = vmul.f32 %v1511_v10, %v47_v27  ;;  %v107_v32 = vadd.f32 %v106_v22, %v74_v11  ;;  %v48_v12 = vld [vmem:[#allocation2 + $0x40] sm:$0xff] }
  0x2c   :  { %v124_v33 = vrot.slane %v77_v23, 4  ;;  %v130_v34 = vrot.slane %v78_v24, 4  ;;  %v136_v35 = vrot.slane %v79_v25, 4  ;;  %v113_v36 = vadd.f32 %v112_v28, %v75_v15 }
  0x2d   :  { %v119_v37 = vadd.f32 %v118_v29, %v76_v19  ;;  %v142_v38 = vrot.slane %v80_v30, 4  ;;  %v148_v39 = vrot.slane %v81_v31, 4  ;;  %v108_v40 = vrot.slane %v107_v32, 2  ;;  %v51_v29 = vld [vmem:[#allocation2 + $0x58] sm:$0xff] }
  0x2e   :  { %v125_v41 = vadd.f32 %v124_v33, %v77_v23  ;;  %v131_v42 = vadd.f32 %v130_v34, %v78_v24  ;;  %v137_v43 = vadd.f32 %v136_v35, %v79_v25  ;;  %v114_v44 = vrot.slane %v113_v36, 2  ;;  %v50_v24 = vld [vmem:[#allocation2 + $0x50] sm:$0xff] }
  0x2f   :  { %v120_v45 = vrot.slane %v119_v37, 2  ;;  %v143_v46 = vadd.f32 %v142_v38, %v80_v30  ;;  %v149_v47 = vadd.f32 %v148_v39, %v81_v31  ;;  %v109_v48 = vadd.f32 %v108_v40, %v107_v32 }
  0x30   :  { %v126_v49 = vrot.slane %v125_v41, 2  ;;  %v132_v50 = vrot.slane %v131_v42, 2  ;;  %v138_v51 = vrot.slane %v137_v43, 2  ;;  %v115_v52 = vadd.f32 %v114_v44, %v113_v36 }
  0x31   :  { %v121_v53 = vadd.f32 %v120_v45, %v119_v37  ;;  %v144_v54 = vrot.slane %v143_v46, 2  ;;  %v150_v55 = vrot.slane %v149_v47, 2  ;;  %v110_v56 = vrot.slane %v109_v48, 1 }
  0x32   :  { %v127_v57 = vadd.f32 %v126_v49, %v125_v41  ;;  %v133_v58 = vadd.f32 %v132_v50, %v131_v42  ;;  %v139_v59 = vadd.f32 %v138_v51, %v137_v43  ;;  %v116_v60 = vrot.slane %v115_v52, 1  ;;  %v53_v51 = vld [vmem:[#allocation2 + $0x68] sm:$0xff] }
  0x33   :  { %v122_v61 = vrot.slane %v121_v53, 1  ;;  %v145_v62 = vadd.f32 %v144_v54, %v143_v46  ;;  %v151_v63 = vadd.f32 %v150_v55, %v149_v47  ;;  %v111_v1 = vadd.f32 %v110_v56, %v109_v48  ;;  %v52_v46 = vld [vmem:[#allocation2 + $0x60] sm:$0xff] }
  0x34   :  { %v128_v3 = vrot.slane %v127_v57, 1  ;;  %v134_v4 = vrot.slane %v133_v58, 1  ;;  %v140_v5 = vrot.slane %v139_v59, 1  ;;  %v117_v6 = vadd.f32 %v116_v60, %v115_v52  ;;  %v54_v52 = vld [vmem:[#allocation2 + $0x70] sm:$0xff] }
  0x35   :  { %v123_v7 = vadd.f32 %v122_v61, %v121_v53  ;;  %v146_v8 = vrot.slane %v145_v62, 1  ;;  %v152_v11 = vrot.slane %v151_v63, 1  ;;  %v310_v14 = vadd.f32 %v1520_v16, %v111_v1 }
  0x36   :  { %v129_v15 = vadd.f32 %v128_v3, %v127_v57  ;;  %v135_v18 = vadd.f32 %v134_v4, %v133_v58  ;;  %v141_v19 = vadd.f32 %v140_v5, %v139_v59  ;;  %v311_v21 = vadd.f32 %v1522_v17, %v117_v6  ;;  %v55_v57 = vld [vmem:[#allocation2 + $0x78] sm:$0xff] }
  0x37   :  { %v312_v0 = vadd.f32 %v1520_v16, %v123_v7  ;;  %v147_v22 = vadd.f32 %v146_v8, %v145_v62  ;;  %v153_v23 = vadd.f32 %v152_v11, %v151_v63  ;;  %v82_v28 = vmul.f32 %v1509_v9, %v48_v12 }
  0x38   :  { %v313_v25 = vadd.f32 %v1522_v17, %v129_v15  ;;  %v314_v26 = vadd.f32 %v1520_v16, %v135_v18  ;;  %v315_v27 = vadd.f32 %v1522_v17, %v141_v19  ;;  %v374_v30 = vcombine.low %v310_v14, %v311_v21 }
  0x39   :  { %v316_v31 = vadd.f32 %v1520_v16, %v147_v22  ;;  %v317_v32 = vadd.f32 %v1522_v17, %v153_v23  ;;  %v83_v33 = vmul.f32 %v1511_v10, %v49_v20  ;;  %v154_v36 = vrot.slane %v82_v28, 4 }
  0x3a   :  { %v389_v34 = vcombine.low %v312_v0, %v313_v25  ;;  %v404_v35 = vcombine.low %v314_v26, %v315_v27  ;;  %v84_v37 = vmul.f32 %v1509_v9, %v50_v24  ;;  %v381_v38 = vrot.slane %v374_v30, %v1517_v13 }
  0x3b   :  { %v419_v39 = vcombine.low %v316_v31, %v317_v32  ;;  %v160_v40 = vrot.slane %v83_v33, 4  ;;  %v85_v41 = vmul.f32 %v1511_v10, %v51_v29  ;;  %v155_v44 = vadd.f32 %v154_v36, %v82_v28  ;;  %v56_v28 = vld [vmem:[#allocation2 + $0x80] sm:$0xff] }
  0x3c   :  { %v396_v42 = vrot.slane %v389_v34, %v1517_v13  ;;  %v411_v43 = vrot.slane %v404_v35, %v1517_v13  ;;  %v166_v45 = vrot.slane %v84_v37, 4  ;;  %v388_v47 = vrot.slane %v381_v38, %v1517_v13 }
  0x3d   :  { %v426_v48 = vrot.slane %v419_v39, %v1517_v13  ;;  %v1552_v49 = vadd.f32 %v160_v40, %v83_v33  ;;  %v172_v50 = vrot.slane %v85_v41, 4  ;;  %v156_v55 = vrot.slane %v155_v44, 2 }
  0x3e   :  { %v403_v53 = vrot.slane %v396_v42, %v1517_v13  ;;  %v418_v54 = vrot.slane %v411_v43, %v1517_v13  ;;  %v1556_v56 = vadd.f32 %v166_v45, %v84_v37  ;;  %634 = vst.msk [vmem:[%s2594_s3] ss:$8 sm:$0x3] %vm1531_vm0, %v388_v47  ;;  %1230 = vst.msk [vmem:[%s2594_s3 + $0x1] ss:$8 sm:$0x3] %vm1531_vm0, %v388_v47 }
  0x3f   :  { %1246 = vst.msk [vmem:[%s2594_s3 + $0x2] ss:$8 sm:$0x3] %vm1531_vm0, %v388_v47  ;;  %1262 = vst.msk [vmem:[%s2594_s3 + $0x3] ss:$8 sm:$0x3] %vm1531_vm0, %v388_v47  ;;  %v433_v58 = vrot.slane %v426_v48, %v1517_v13  ;;  %v173_v60 = vadd.f32 %v172_v50, %v85_v41  ;;  %v86_v61 = vmul.f32 %v1509_v9, %v52_v46 }
  0x40   :  { %1278 = vst.msk [vmem:[%s2594_s3 + $0x4] ss:$8 sm:$0x3] %vm1531_vm0, %v388_v47  ;;  %1294 = vst.msk [vmem:[%s2594_s3 + $0x5] ss:$8 sm:$0x3] %vm1531_vm0, %v388_v47  ;;  %v157_v62 = vadd.f32 %v156_v55, %v155_v44  ;;  %v87_v1 = vmul.f32 %v1511_v10, %v53_v51  ;;  %v88_v3 = vmul.f32 %v1509_v9, %v54_v52 }
  0x41   :  { %1310 = vst.msk [vmem:[%s2594_s3 + $0x6] ss:$8 sm:$0x3] %vm1531_vm0, %v388_v47  ;;  %1326 = vst.msk [vmem:[%s2594_s3 + $0x7] ss:$8 sm:$0x3] %vm1531_vm0, %v388_v47  ;;  %v89_v7 = vmul.f32 %v1511_v10, %v55_v57  ;;  %v90_v41 = vmul.f32 %v1509_v9, %v56_v28 }
  0x42   :  { %1342 = vst.msk [vmem:[%s2594_s3 + $0x10] ss:$8 sm:$0x3] %vm1531_vm0, %v388_v47  ;;  %1358 = vst.msk [vmem:[%s2594_s3 + $0x11] ss:$8 sm:$0x3] %vm1531_vm0, %v388_v47 }
  0x43   :  { %1374 = vst.msk [vmem:[%s2594_s3 + $0x12] ss:$8 sm:$0x3] %vm1531_vm0, %v388_v47  ;;  %1390 = vst.msk [vmem:[%s2594_s3 + $0x13] ss:$8 sm:$0x3] %vm1531_vm0, %v388_v47 }
  0x44   :  { %v162_v59 = vrot.slane %v1552_v49, 2  ;;  %1215 = vst.msk [vmem:[%s2594_s3 + $0x20] ss:$8 sm:$0x3] %vm1531_vm0, %v403_v53  ;;  %v168_v63 = vrot.slane %v1556_v56, 2  ;;  %v174_v5 = vrot.slane %v173_v60, 2 }
  0x45   :  { %1231 = vst.msk [vmem:[%s2594_s3 + $0x21] ss:$8 sm:$0x3] %vm1531_vm0, %v403_v53  ;;  %1247 = vst.msk [vmem:[%s2594_s3 + $0x22] ss:$8 sm:$0x3] %vm1531_vm0, %v403_v53 }
  0x46   :  { %1263 = vst.msk [vmem:[%s2594_s3 + $0x23] ss:$8 sm:$0x3] %vm1531_vm0, %v403_v53  ;;  %1279 = vst.msk [vmem:[%s2594_s3 + $0x24] ss:$8 sm:$0x3] %vm1531_vm0, %v403_v53  ;;  %v163_v4 = vadd.f32 %v162_v59, %v1552_v49  ;;  %v169_v11 = vadd.f32 %v168_v63, %v1556_v56  ;;  %v175_v18 = vadd.f32 %v174_v5, %v173_v60 }
  0x47   :  { %1295 = vst.msk [vmem:[%s2594_s3 + $0x25] ss:$8 sm:$0x3] %vm1531_vm0, %v403_v53  ;;  %1311 = vst.msk [vmem:[%s2594_s3 + $0x26] ss:$8 sm:$0x3] %vm1531_vm0, %v403_v53 }
  0x48   :  { %1327 = vst.msk [vmem:[%s2594_s3 + $0x27] ss:$8 sm:$0x3] %vm1531_vm0, %v403_v53  ;;  %1343 = vst.msk [vmem:[%s2594_s3 + $0x30] ss:$8 sm:$0x3] %vm1531_vm0, %v403_v53 }
  0x49   :  { %1359 = vst.msk [vmem:[%s2594_s3 + $0x31] ss:$8 sm:$0x3] %vm1531_vm0, %v403_v53  ;;  %1375 = vst.msk [vmem:[%s2594_s3 + $0x32] ss:$8 sm:$0x3] %vm1531_vm0, %v403_v53 }
  0x4a   :  { %1391 = vst.msk [vmem:[%s2594_s3 + $0x33] ss:$8 sm:$0x3] %vm1531_vm0, %v403_v53  ;;  %1216 = vst.msk [vmem:[%s2594_s3 + $0x40] ss:$8 sm:$0x3] %vm1531_vm0, %v418_v54 }
  0x4b   :  { %1232 = vst.msk [vmem:[%s2594_s3 + $0x41] ss:$8 sm:$0x3] %vm1531_vm0, %v418_v54  ;;  %1248 = vst.msk [vmem:[%s2594_s3 + $0x42] ss:$8 sm:$0x3] %vm1531_vm0, %v418_v54 }
  0x4c   :  { %1264 = vst.msk [vmem:[%s2594_s3 + $0x43] ss:$8 sm:$0x3] %vm1531_vm0, %v418_v54  ;;  %1280 = vst.msk [vmem:[%s2594_s3 + $0x44] ss:$8 sm:$0x3] %vm1531_vm0, %v418_v54 }
  0x4d   :  { %1296 = vst.msk [vmem:[%s2594_s3 + $0x45] ss:$8 sm:$0x3] %vm1531_vm0, %v418_v54  ;;  %1312 = vst.msk [vmem:[%s2594_s3 + $0x46] ss:$8 sm:$0x3] %vm1531_vm0, %v418_v54 }
  0x4e   :  { %1328 = vst.msk [vmem:[%s2594_s3 + $0x47] ss:$8 sm:$0x3] %vm1531_vm0, %v418_v54  ;;  %1344 = vst.msk [vmem:[%s2594_s3 + $0x50] ss:$8 sm:$0x3] %vm1531_vm0, %v418_v54 }
  0x4f   :  { %1360 = vst.msk [vmem:[%s2594_s3 + $0x51] ss:$8 sm:$0x3] %vm1531_vm0, %v418_v54  ;;  %1376 = vst.msk [vmem:[%s2594_s3 + $0x52] ss:$8 sm:$0x3] %vm1531_vm0, %v418_v54 }
  0x50   :  { %1392 = vst.msk [vmem:[%s2594_s3 + $0x53] ss:$8 sm:$0x3] %vm1531_vm0, %v418_v54  ;;  %1217 = vst.msk [vmem:[%s2594_s3 + $0x60] ss:$8 sm:$0x3] %vm1531_vm0, %v433_v58 }
  0x51   :  { %1233 = vst.msk [vmem:[%s2594_s3 + $0x61] ss:$8 sm:$0x3] %vm1531_vm0, %v433_v58  ;;  %1249 = vst.msk [vmem:[%s2594_s3 + $0x62] ss:$8 sm:$0x3] %vm1531_vm0, %v433_v58 }
  0x52   :  { %1265 = vst.msk [vmem:[%s2594_s3 + $0x63] ss:$8 sm:$0x3] %vm1531_vm0, %v433_v58  ;;  %1281 = vst.msk [vmem:[%s2594_s3 + $0x64] ss:$8 sm:$0x3] %vm1531_vm0, %v433_v58 }
  0x53   :  { %1297 = vst.msk [vmem:[%s2594_s3 + $0x65] ss:$8 sm:$0x3] %vm1531_vm0, %v433_v58  ;;  %1313 = vst.msk [vmem:[%s2594_s3 + $0x66] ss:$8 sm:$0x3] %vm1531_vm0, %v433_v58 }
  0x54   :  { %1329 = vst.msk [vmem:[%s2594_s3 + $0x67] ss:$8 sm:$0x3] %vm1531_vm0, %v433_v58  ;;  %1345 = vst.msk [vmem:[%s2594_s3 + $0x70] ss:$8 sm:$0x3] %vm1531_vm0, %v433_v58 }
  0x55   :  { %1361 = vst.msk [vmem:[%s2594_s3 + $0x71] ss:$8 sm:$0x3] %vm1531_vm0, %v433_v58  ;;  %1377 = vst.msk [vmem:[%s2594_s3 + $0x72] ss:$8 sm:$0x3] %vm1531_vm0, %v433_v58 }
  0x56   :  { %1393 = vst.msk [vmem:[%s2594_s3 + $0x73] ss:$8 sm:$0x3] %vm1531_vm0, %v433_v58  ;;  %v178_v6 = vrot.slane %v86_v61, 4  ;;  %v158_v8 = vrot.slane %v157_v62, 1  ;;  %v184_v12 = vrot.slane %v87_v1, 4 }
  0x57   :  { %v190_v14 = vrot.slane %v88_v3, 4  ;;  %v164_v15 = vrot.slane %v163_v4, 1  ;;  %v196_v20 = vrot.slane %v89_v7, 4  ;;  %v170_v0 = vrot.slane %v169_v11, 1  ;;  %v57_v37 = vld [vmem:[#allocation2 + $0x88] sm:$0xff]  ;;  %v58_v58 = vld [vmem:[#allocation2 + $0x90] sm:$0xff] }
  0x58   :  { %v179_v19 = vadd.f32 %v178_v6, %v86_v61  ;;  %v159_v21 = vadd.f32 %v158_v8, %v157_v62  ;;  %v185_v22 = vadd.f32 %v184_v12, %v87_v1  ;;  %v176_v25 = vrot.slane %v175_v18, 1  ;;  %v59_v59 = vld [vmem:[#allocation2 + $0x98] sm:$0xff]  ;;  %v60_v1 = vld [vmem:[#allocation2 + $0xa0] sm:$0xff] }
  0x59   :  { %v191_v23 = vadd.f32 %v190_v14, %v88_v3  ;;  %v165_v24 = vadd.f32 %v164_v15, %v163_v4  ;;  %v197_v27 = vadd.f32 %v196_v20, %v89_v7  ;;  %v171_v30 = vadd.f32 %v170_v0, %v169_v11  ;;  %v61_v7 = vld [vmem:[#allocation2 + $0xa8] sm:$0xff] }
  0x5a   :  { %v180_v26 = vrot.slane %v179_v19, 2  ;;  %v318_v29 = vadd.f32 %v1520_v16, %v159_v21  ;;  %v186_v31 = vrot.slane %v185_v22, 2  ;;  %v177_v34 = vadd.f32 %v176_v25, %v175_v18 }
  0x5b   :  { %v192_v32 = vrot.slane %v191_v23, 2  ;;  %v319_v33 = vadd.f32 %v1522_v17, %v165_v24  ;;  %v198_v36 = vrot.slane %v197_v27, 2  ;;  %v320_v38 = vadd.f32 %v1520_v16, %v171_v30 }
  0x5c   :  { %v181_v35 = vadd.f32 %v180_v26, %v179_v19  ;;  %v187_v39 = vadd.f32 %v186_v31, %v185_v22  ;;  %v321_v43 = vadd.f32 %v1522_v17, %v177_v34  ;;  %v91_v48 = vmul.f32 %v1511_v10, %v57_v37  ;;  %v63_v37 = vld [vmem:[#allocation2 + $0xb8] sm:$0xff] }
  0x5d   :  { %v193_v40 = vadd.f32 %v192_v32, %v191_v23  ;;  %v434_v42 = vcombine.low %v318_v29, %v319_v33  ;;  %v199_v45 = vadd.f32 %v198_v36, %v197_v27  ;;  %v202_v49 = vrot.slane %v90_v41, 4  ;;  %v62_v32 = vld [vmem:[#allocation2 + $0xb0] sm:$0xff] }
  0x5e   :  { %v182_v44 = vrot.slane %v181_v35, 1  ;;  %v188_v46 = vrot.slane %v187_v39, 1  ;;  %v449_v51 = vcombine.low %v320_v38, %v321_v43  ;;  %v208_v57 = vrot.slane %v91_v48, 4 }
  0x5f   :  { %v194_v47 = vrot.slane %v193_v40, 1  ;;  %v441_v50 = vrot.slane %v434_v42, %v1517_v13  ;;  %v200_v53 = vrot.slane %v199_v45, 1  ;;  %v203_v56 = vadd.f32 %v202_v49, %v90_v41  ;;  %v64_v42 = vld [vmem:[#allocation2 + $0xc0] sm:$0xff] }
  0x60   :  { %v183_v52 = vadd.f32 %v182_v44, %v181_v35  ;;  %v189_v54 = vadd.f32 %v188_v46, %v187_v39  ;;  %v456_v61 = vrot.slane %v449_v51, %v1517_v13  ;;  %v209_v6 = vadd.f32 %v208_v57, %v91_v48  ;;  %v65_v51 = vld [vmem:[#allocation2 + $0xc8] sm:$0xff] }
  0x61   :  { %v195_v55 = vadd.f32 %v194_v47, %v193_v40  ;;  %v448_v60 = vrot.slane %v441_v50, %v1517_v13  ;;  %v201_v63 = vadd.f32 %v200_v53, %v199_v45  ;;  %v204_v5 = vrot.slane %v203_v56, 2 }
  0x62   :  { %v322_v62 = vadd.f32 %v1520_v16, %v183_v52  ;;  %v323_v3 = vadd.f32 %v1522_v17, %v189_v54  ;;  %v463_v8 = vrot.slane %v456_v61, %v1517_v13  ;;  %v92_v12 = vmul.f32 %v1509_v9, %v58_v58 }
  0x63   :  { %v324_v4 = vadd.f32 %v1520_v16, %v195_v55  ;;  %1218 = vst.msk [vmem:[%s2594_s3 + $0x80] ss:$8 sm:$0x3] %vm1531_vm0, %v448_v60  ;;  %1234 = vst.msk [vmem:[%s2594_s3 + $0x81] ss:$8 sm:$0x3] %vm1531_vm0, %v448_v60  ;;  %v325_v11 = vadd.f32 %v1522_v17, %v201_v63  ;;  %v93_v14 = vmul.f32 %v1511_v10, %v59_v59 }
  0x64   :  { %1250 = vst.msk [vmem:[%s2594_s3 + $0x82] ss:$8 sm:$0x3] %vm1531_vm0, %v448_v60  ;;  %1266 = vst.msk [vmem:[%s2594_s3 + $0x83] ss:$8 sm:$0x3] %vm1531_vm0, %v448_v60  ;;  %v464_v15 = vcombine.low %v322_v62, %v323_v3  ;;  %v205_v18 = vadd.f32 %v204_v5, %v203_v56  ;;  %v94_v20 = vmul.f32 %v1509_v9, %v60_v1 }
  0x65   :  { %1282 = vst.msk [vmem:[%s2594_s3 + $0x84] ss:$8 sm:$0x3] %vm1531_vm0, %v448_v60  ;;  %1298 = vst.msk [vmem:[%s2594_s3 + $0x85] ss:$8 sm:$0x3] %vm1531_vm0, %v448_v60  ;;  %v479_v21 = vcombine.low %v324_v4, %v325_v11  ;;  %v95_v23 = vmul.f32 %v1511_v10, %v61_v7  ;;  %v96_v46 = vmul.f32 %v1509_v9, %v62_v32 }
  0x66   :  { %1314 = vst.msk [vmem:[%s2594_s3 + $0x86] ss:$8 sm:$0x3] %vm1531_vm0, %v448_v60  ;;  %1330 = vst.msk [vmem:[%s2594_s3 + $0x87] ss:$8 sm:$0x3] %vm1531_vm0, %v448_v60  ;;  %v471_v24 = vrot.slane %v464_v15, %v1517_v13  ;;  %v97_v50 = vmul.f32 %v1511_v10, %v63_v37  ;;  %v98_v55 = vmul.f32 %v1509_v9, %v64_v42 }
  0x67   :  { %1346 = vst.msk [vmem:[%s2594_s3 + $0x90] ss:$8 sm:$0x3] %vm1531_vm0, %v448_v60  ;;  %1362 = vst.msk [vmem:[%s2594_s3 + $0x91] ss:$8 sm:$0x3] %vm1531_vm0, %v448_v60  ;;  %v486_v28 = vrot.slane %v479_v21, %v1517_v13  ;;  %v99_v63 = vmul.f32 %v1511_v10, %v65_v51 }
  0x68   :  { %1378 = vst.msk [vmem:[%s2594_s3 + $0x92] ss:$8 sm:$0x3] %vm1531_vm0, %v448_v60  ;;  %1394 = vst.msk [vmem:[%s2594_s3 + $0x93] ss:$8 sm:$0x3] %vm1531_vm0, %v448_v60  ;;  %v478_v33 = vrot.slane %v471_v24, %v1517_v13 }
  0x69   :  { %v210_v19 = vrot.slane %v209_v6, 2  ;;  %1219 = vst.msk [vmem:[%s2594_s3 + $0xa0] ss:$8 sm:$0x3] %vm1531_vm0, %v463_v8  ;;  %v214_v0 = vrot.slane %v92_v12, 4  ;;  %v220_v22 = vrot.slane %v93_v14, 4  ;;  %v493_v38 = vrot.slane %v486_v28, %v1517_v13 }
  0x6a   :  { %1235 = vst.msk [vmem:[%s2594_s3 + $0xa1] ss:$8 sm:$0x3] %vm1531_vm0, %v463_v8  ;;  %1251 = vst.msk [vmem:[%s2594_s3 + $0xa2] ss:$8 sm:$0x3] %vm1531_vm0, %v463_v8 }
  0x6b   :  { %1267 = vst.msk [vmem:[%s2594_s3 + $0xa3] ss:$8 sm:$0x3] %vm1531_vm0, %v463_v8  ;;  %1283 = vst.msk [vmem:[%s2594_s3 + $0xa4] ss:$8 sm:$0x3] %vm1531_vm0, %v463_v8  ;;  %v211_v26 = vadd.f32 %v210_v19, %v209_v6  ;;  %v215_v29 = vadd.f32 %v214_v0, %v92_v12  ;;  %v221_v30 = vadd.f32 %v220_v22, %v93_v14 }
  0x6c   :  { %1299 = vst.msk [vmem:[%s2594_s3 + $0xa5] ss:$8 sm:$0x3] %vm1531_vm0, %v463_v8  ;;  %1315 = vst.msk [vmem:[%s2594_s3 + $0xa6] ss:$8 sm:$0x3] %vm1531_vm0, %v463_v8 }
  0x6d   :  { %1331 = vst.msk [vmem:[%s2594_s3 + $0xa7] ss:$8 sm:$0x3] %vm1531_vm0, %v463_v8  ;;  %1347 = vst.msk [vmem:[%s2594_s3 + $0xb0] ss:$8 sm:$0x3] %vm1531_vm0, %v463_v8 }
  0x6e   :  { %1363 = vst.msk [vmem:[%s2594_s3 + $0xb1] ss:$8 sm:$0x3] %vm1531_vm0, %v463_v8  ;;  %1379 = vst.msk [vmem:[%s2594_s3 + $0xb2] ss:$8 sm:$0x3] %vm1531_vm0, %v463_v8 }
  0x6f   :  { %1395 = vst.msk [vmem:[%s2594_s3 + $0xb3] ss:$8 sm:$0x3] %vm1531_vm0, %v463_v8  ;;  %v206_v25 = vrot.slane %v205_v18, 1  ;;  %v226_v27 = vrot.slane %v94_v20, 4  ;;  %v232_v31 = vrot.slane %v95_v23, 4 }
  0x70   :  { %v212_v35 = vrot.slane %v211_v26, 1  ;;  %v216_v39 = vrot.slane %v215_v29, 2  ;;  %v222_v40 = vrot.slane %v221_v30, 2  ;;  %1220 = vst.msk [vmem:[%s2594_s3 + $0xc0] ss:$8 sm:$0x3] %vm1531_vm0, %v478_v33 }
  0x71   :  { %v207_v34 = vadd.f32 %v206_v25, %v205_v18  ;;  %v227_v36 = vadd.f32 %v226_v27, %v94_v20  ;;  %v233_v41 = vadd.f32 %v232_v31, %v95_v23  ;;  %1236 = vst.msk [vmem:[%s2594_s3 + $0xc1] ss:$8 sm:$0x3] %vm1531_vm0, %v478_v33  ;;  %1252 = vst.msk [vmem:[%s2594_s3 + $0xc2] ss:$8 sm:$0x3] %vm1531_vm0, %v478_v33 }
  0x72   :  { %1268 = vst.msk [vmem:[%s2594_s3 + $0xc3] ss:$8 sm:$0x3] %vm1531_vm0, %v478_v33  ;;  %1284 = vst.msk [vmem:[%s2594_s3 + $0xc4] ss:$8 sm:$0x3] %vm1531_vm0, %v478_v33  ;;  %v213_v43 = vadd.f32 %v212_v35, %v211_v26  ;;  %v217_v47 = vadd.f32 %v216_v39, %v215_v29  ;;  %v223_v48 = vadd.f32 %v222_v40, %v221_v30 }
  0x73   :  { %1300 = vst.msk [vmem:[%s2594_s3 + $0xc5] ss:$8 sm:$0x3] %vm1531_vm0, %v478_v33  ;;  %1316 = vst.msk [vmem:[%s2594_s3 + $0xc6] ss:$8 sm:$0x3] %vm1531_vm0, %v478_v33  ;;  %v326_v44 = vadd.f32 %v1520_v16, %v207_v34 }
  0x74   :  { %1332 = vst.msk [vmem:[%s2594_s3 + $0xc7] ss:$8 sm:$0x3] %vm1531_vm0, %v478_v33  ;;  %1348 = vst.msk [vmem:[%s2594_s3 + $0xd0] ss:$8 sm:$0x3] %vm1531_vm0, %v478_v33  ;;  %v327_v52 = vadd.f32 %v1522_v17, %v213_v43 }
  0x75   :  { %1364 = vst.msk [vmem:[%s2594_s3 + $0xd1] ss:$8 sm:$0x3] %vm1531_vm0, %v478_v33  ;;  %1380 = vst.msk [vmem:[%s2594_s3 + $0xd2] ss:$8 sm:$0x3] %vm1531_vm0, %v478_v33 }
  0x76   :  { %1396 = vst.msk [vmem:[%s2594_s3 + $0xd3] ss:$8 sm:$0x3] %vm1531_vm0, %v478_v33  ;;  %v228_v45 = vrot.slane %v227_v36, 2  ;;  %v234_v49 = vrot.slane %v233_v41, 2  ;;  %v238_v54 = vrot.slane %v96_v46, 4  ;;  %v494_v60 = vcombine.low %v326_v44, %v327_v52 }
  0x77   :  { %1221 = vst.msk [vmem:[%s2594_s3 + $0xe0] ss:$8 sm:$0x3] %vm1531_vm0, %v493_v38  ;;  %1237 = vst.msk [vmem:[%s2594_s3 + $0xe1] ss:$8 sm:$0x3] %vm1531_vm0, %v493_v38 }
  0x78   :  { %1253 = vst.msk [vmem:[%s2594_s3 + $0xe2] ss:$8 sm:$0x3] %vm1531_vm0, %v493_v38  ;;  %1269 = vst.msk [vmem:[%s2594_s3 + $0xe3] ss:$8 sm:$0x3] %vm1531_vm0, %v493_v38  ;;  %v229_v53 = vadd.f32 %v228_v45, %v227_v36  ;;  %v235_v58 = vadd.f32 %v234_v49, %v233_v41  ;;  %v239_v62 = vadd.f32 %v238_v54, %v96_v46 }
  0x79   :  { %1285 = vst.msk [vmem:[%s2594_s3 + $0xe4] ss:$8 sm:$0x3] %vm1531_vm0, %v493_v38  ;;  %1301 = vst.msk [vmem:[%s2594_s3 + $0xe5] ss:$8 sm:$0x3] %vm1531_vm0, %v493_v38  ;;  %v501_v6 = vrot.slane %v494_v60, %v1517_v13 }
  0x7a   :  { %1317 = vst.msk [vmem:[%s2594_s3 + $0xe6] ss:$8 sm:$0x3] %vm1531_vm0, %v493_v38  ;;  %1333 = vst.msk [vmem:[%s2594_s3 + $0xe7] ss:$8 sm:$0x3] %vm1531_vm0, %v493_v38 }
  0x7b   :  { %1349 = vst.msk [vmem:[%s2594_s3 + $0xf0] ss:$8 sm:$0x3] %vm1531_vm0, %v493_v38  ;;  %1365 = vst.msk [vmem:[%s2594_s3 + $0xf1] ss:$8 sm:$0x3] %vm1531_vm0, %v493_v38  ;;  %v508_v21 = vrot.slane %v501_v6, %v1517_v13 }
  0x7c   :  { %1381 = vst.msk [vmem:[%s2594_s3 + $0xf2] ss:$8 sm:$0x3] %vm1531_vm0, %v493_v38  ;;  %1397 = vst.msk [vmem:[%s2594_s3 + $0xf3] ss:$8 sm:$0x3] %vm1531_vm0, %v493_v38 }
  0x7d   :  { %v218_v56 = vrot.slane %v217_v47, 1  ;;  %v224_v57 = vrot.slane %v223_v48, 1  ;;  %v244_v59 = vrot.slane %v97_v50, 4  ;;  %v230_v61 = vrot.slane %v229_v53, 1  ;;  %v66_v19 = vld [vmem:[#allocation2 + $0xd0] sm:$0xff]  ;;  %v67_v20 = vld [vmem:[#allocation2 + $0xd8] sm:$0xff] }
  0x7e   :  { %v236_v4 = vrot.slane %v235_v58, 1  ;;  %v240_v8 = vrot.slane %v239_v62, 2  ;;  %v250_v11 = vrot.slane %v98_v55, 4  ;;  %v256_v27 = vrot.slane %v99_v63, 4  ;;  %v68_v40 = vld [vmem:[#allocation2 + $0xe0] sm:$0xff]  ;;  %v69_v45 = vld [vmem:[#allocation2 + $0xe8] sm:$0xff] }
  0x7f   :  { %v219_v1 = vadd.f32 %v218_v56, %v217_v47  ;;  %v225_v3 = vadd.f32 %v224_v57, %v223_v48  ;;  %v245_v5 = vadd.f32 %v244_v59, %v97_v50  ;;  %v231_v7 = vadd.f32 %v230_v61, %v229_v53  ;;  %1222 = vst.msk [vmem:[%s2594_s3 + $0x100] ss:$8 sm:$0x3] %vm1531_vm0, %v508_v21  ;;  %v70_v50 = vld [vmem:[#allocation2 + $0xf0] sm:$0xff]  ;;  %v71_v59 = vld [vmem:[#allocation2 + $0xf8] sm:$0xff] }
  0x80   :  { %v237_v15 = vadd.f32 %v236_v4, %v235_v58  ;;  %v241_v22 = vadd.f32 %v240_v8, %v239_v62  ;;  %v251_v23 = vadd.f32 %v250_v11, %v98_v55  ;;  %1238 = vst.msk [vmem:[%s2594_s3 + $0x101] ss:$8 sm:$0x3] %vm1531_vm0, %v508_v21  ;;  %1254 = vst.msk [vmem:[%s2594_s3 + $0x102] ss:$8 sm:$0x3] %vm1531_vm0, %v508_v21 }
  0x81   :  { %v328_v12 = vadd.f32 %v1520_v16, %v219_v1  ;;  %v329_v14 = vadd.f32 %v1522_v17, %v225_v3  ;;  %v246_v18 = vrot.slane %v245_v5, 2  ;;  %v330_v0 = vadd.f32 %v1520_v16, %v231_v7  ;;  %1270 = vst.msk [vmem:[%s2594_s3 + $0x103] ss:$8 sm:$0x3] %vm1531_vm0, %v508_v21 }
  0x82   :  { %v331_v25 = vadd.f32 %v1522_v17, %v237_v15  ;;  %1286 = vst.msk [vmem:[%s2594_s3 + $0x104] ss:$8 sm:$0x3] %vm1531_vm0, %v508_v21  ;;  %1302 = vst.msk [vmem:[%s2594_s3 + $0x105] ss:$8 sm:$0x3] %vm1531_vm0, %v508_v21  ;;  %v100_v30 = vmul.f32 %v1509_v9, %v66_v19  ;;  %v101_v31 = vmul.f32 %v1511_v10, %v67_v20 }
  0x83   :  { %v509_v24 = vcombine.low %v328_v12, %v329_v14  ;;  %v247_v26 = vadd.f32 %v246_v18, %v245_v5  ;;  %1318 = vst.msk [vmem:[%s2594_s3 + $0x106] ss:$8 sm:$0x3] %vm1531_vm0, %v508_v21  ;;  %1334 = vst.msk [vmem:[%s2594_s3 + $0x107] ss:$8 sm:$0x3] %vm1531_vm0, %v508_v21  ;;  %v257_v35 = vadd.f32 %v256_v27, %v99_v63 }
  0x84   :  { %1350 = vst.msk [vmem:[%s2594_s3 + $0x110] ss:$8 sm:$0x3] %vm1531_vm0, %v508_v21  ;;  %1366 = vst.msk [vmem:[%s2594_s3 + $0x111] ss:$8 sm:$0x3] %vm1531_vm0, %v508_v21  ;;  %v524_v33 = vcombine.low %v330_v0, %v331_v25  ;;  %v102_v54 = vmul.f32 %v1509_v9, %v68_v40  ;;  %v103_v58 = vmul.f32 %v1511_v10, %v69_v45 }
  0x85   :  { %1382 = vst.msk [vmem:[%s2594_s3 + $0x112] ss:$8 sm:$0x3] %vm1531_vm0, %v508_v21  ;;  %1398 = vst.msk [vmem:[%s2594_s3 + $0x113] ss:$8 sm:$0x3] %vm1531_vm0, %v508_v21  ;;  %v516_v32 = vrot.slane %v509_v24, %v1517_v13  ;;  %v104_v63 = vmul.f32 %v1509_v9, %v70_v50  ;;  %v105_v11 = vmul.f32 %v1511_v10, %v71_v59 }
  0x86   :  { %v242_v28 = vrot.slane %v241_v22, 1  ;;  %v252_v29 = vrot.slane %v251_v23, 2  ;;  %v248_v34 = vrot.slane %v247_v26, 1  ;;  %v262_v38 = vrot.slane %v100_v30, 4 }
  0x87   :  { %v268_v39 = vrot.slane %v101_v31, 4  ;;  %v523_v41 = vrot.slane %v516_v32, %v1517_v13  ;;  %v531_v42 = vrot.slane %v524_v33, %v1517_v13  ;;  %v258_v44 = vrot.slane %v257_v35, 2 }
  0x88   :  { %v243_v36 = vadd.f32 %v242_v28, %v241_v22  ;;  %v253_v37 = vadd.f32 %v252_v29, %v251_v23  ;;  %v249_v43 = vadd.f32 %v248_v34, %v247_v26  ;;  %v263_v48 = vadd.f32 %v262_v38, %v100_v30 }
  0x89   :  { %v269_v49 = vadd.f32 %v268_v39, %v101_v31  ;;  %1223 = vst.msk [vmem:[%s2594_s3 + $0x120] ss:$8 sm:$0x3] %vm1531_vm0, %v523_v41  ;;  %1239 = vst.msk [vmem:[%s2594_s3 + $0x121] ss:$8 sm:$0x3] %vm1531_vm0, %v523_v41  ;;  %v538_v51 = vrot.slane %v531_v42, %v1517_v13  ;;  %v259_v53 = vadd.f32 %v258_v44, %v257_v35 }
  0x8a   :  { %v332_v46 = vadd.f32 %v1520_v16, %v243_v36  ;;  %v254_v47 = vrot.slane %v253_v37, 1  ;;  %1255 = vst.msk [vmem:[%s2594_s3 + $0x122] ss:$8 sm:$0x3] %vm1531_vm0, %v523_v41  ;;  %v333_v52 = vadd.f32 %v1522_v17, %v249_v43  ;;  %v264_v56 = vrot.slane %v263_v48, 2 }
  0x8b   :  { %1271 = vst.msk [vmem:[%s2594_s3 + $0x123] ss:$8 sm:$0x3] %vm1531_vm0, %v523_v41  ;;  %1287 = vst.msk [vmem:[%s2594_s3 + $0x124] ss:$8 sm:$0x3] %vm1531_vm0, %v523_v41 }
  0x8c   :  { %1303 = vst.msk [vmem:[%s2594_s3 + $0x125] ss:$8 sm:$0x3] %vm1531_vm0, %v523_v41  ;;  %1319 = vst.msk [vmem:[%s2594_s3 + $0x126] ss:$8 sm:$0x3] %vm1531_vm0, %v523_v41  ;;  %v255_v55 = vadd.f32 %v254_v47, %v253_v37  ;;  %v539_v60 = vcombine.low %v332_v46, %v333_v52  ;;  %v265_v3 = vadd.f32 %v264_v56, %v263_v48 }
  0x8d   :  { %1335 = vst.msk [vmem:[%s2594_s3 + $0x127] ss:$8 sm:$0x3] %vm1531_vm0, %v523_v41  ;;  %1351 = vst.msk [vmem:[%s2594_s3 + $0x130] ss:$8 sm:$0x3] %vm1531_vm0, %v523_v41 }
  0x8e   :  { %1367 = vst.msk [vmem:[%s2594_s3 + $0x131] ss:$8 sm:$0x3] %vm1531_vm0, %v523_v41  ;;  %1383 = vst.msk [vmem:[%s2594_s3 + $0x132] ss:$8 sm:$0x3] %vm1531_vm0, %v523_v41  ;;  %v334_v1 = vadd.f32 %v1520_v16, %v255_v55  ;;  %v546_v6 = vrot.slane %v539_v60, %v1517_v13 }
  0x8f   :  { %1399 = vst.msk [vmem:[%s2594_s3 + $0x133] ss:$8 sm:$0x3] %vm1531_vm0, %v523_v41  ;;  %v270_v57 = vrot.slane %v269_v49, 2  ;;  %v260_v61 = vrot.slane %v259_v53, 1  ;;  %v274_v62 = vrot.slane %v102_v54, 4 }
  0x90   :  { %1224 = vst.msk [vmem:[%s2594_s3 + $0x140] ss:$8 sm:$0x3] %vm1531_vm0, %v538_v51  ;;  %1240 = vst.msk [vmem:[%s2594_s3 + $0x141] ss:$8 sm:$0x3] %vm1531_vm0, %v538_v51  ;;  %v553_v19 = vrot.slane %v546_v6, %v1517_v13 }
  0x91   :  { %1256 = vst.msk [vmem:[%s2594_s3 + $0x142] ss:$8 sm:$0x3] %vm1531_vm0, %v538_v51  ;;  %1272 = vst.msk [vmem:[%s2594_s3 + $0x143] ss:$8 sm:$0x3] %vm1531_vm0, %v538_v51  ;;  %v271_v4 = vadd.f32 %v270_v57, %v269_v49  ;;  %v261_v7 = vadd.f32 %v260_v61, %v259_v53  ;;  %v275_v8 = vadd.f32 %v274_v62, %v102_v54 }
  0x92   :  { %1288 = vst.msk [vmem:[%s2594_s3 + $0x144] ss:$8 sm:$0x3] %vm1531_vm0, %v538_v51  ;;  %1304 = vst.msk [vmem:[%s2594_s3 + $0x145] ss:$8 sm:$0x3] %vm1531_vm0, %v538_v51 }
  0x93   :  { %1320 = vst.msk [vmem:[%s2594_s3 + $0x146] ss:$8 sm:$0x3] %vm1531_vm0, %v538_v51  ;;  %1336 = vst.msk [vmem:[%s2594_s3 + $0x147] ss:$8 sm:$0x3] %vm1531_vm0, %v538_v51  ;;  %v335_v20 = vadd.f32 %v1522_v17, %v261_v7 }
  0x94   :  { %1352 = vst.msk [vmem:[%s2594_s3 + $0x150] ss:$8 sm:$0x3] %vm1531_vm0, %v538_v51  ;;  %1368 = vst.msk [vmem:[%s2594_s3 + $0x151] ss:$8 sm:$0x3] %vm1531_vm0, %v538_v51 }
  0x95   :  { %1384 = vst.msk [vmem:[%s2594_s3 + $0x152] ss:$8 sm:$0x3] %vm1531_vm0, %v538_v51  ;;  %1400 = vst.msk [vmem:[%s2594_s3 + $0x153] ss:$8 sm:$0x3] %vm1531_vm0, %v538_v51  ;;  %v554_v10 = vcombine.low %v334_v1, %v335_v20 }
  0x96   :  { %v280_v5 = vrot.slane %v103_v58, 4  ;;  %v266_v12 = vrot.slane %v265_v3, 1  ;;  %v272_v14 = vrot.slane %v271_v4, 1  ;;  %v286_v18 = vrot.slane %v104_v63, 4 }
  0x97   :  { %v276_v9 = vrot.slane %v275_v8, 2  ;;  %v292_v21 = vrot.slane %v105_v11, 4  ;;  %1225 = vst.msk [vmem:[%s2594_s3 + $0x160] ss:$8 sm:$0x3] %vm1531_vm0, %v553_v19  ;;  %v561_v31 = vrot.slane %v554_v10, %v1517_v13 }
  0x98   :  { %v281_v15 = vadd.f32 %v280_v5, %v103_v58  ;;  %v267_v0 = vadd.f32 %v266_v12, %v265_v3  ;;  %v273_v22 = vadd.f32 %v272_v14, %v271_v4  ;;  %v287_v24 = vadd.f32 %v286_v18, %v104_v63  ;;  %1241 = vst.msk [vmem:[%s2594_s3 + $0x161] ss:$8 sm:$0x3] %vm1531_vm0, %v553_v19 }
  0x99   :  { %1257 = vst.msk [vmem:[%s2594_s3 + $0x162] ss:$8 sm:$0x3] %vm1531_vm0, %v553_v19  ;;  %1273 = vst.msk [vmem:[%s2594_s3 + $0x163] ss:$8 sm:$0x3] %vm1531_vm0, %v553_v19  ;;  %v277_v25 = vadd.f32 %v276_v9, %v275_v8  ;;  %v293_v26 = vadd.f32 %v292_v21, %v105_v11  ;;  %v568_v37 = vrot.slane %v561_v31, %v1517_v13 }
  0x9a   :  { %v282_v23 = vrot.slane %v281_v15, 2  ;;  %1289 = vst.msk [vmem:[%s2594_s3 + $0x164] ss:$8 sm:$0x3] %vm1531_vm0, %v553_v19  ;;  %v336_v27 = vadd.f32 %v1520_v16, %v267_v0  ;;  %v337_v28 = vadd.f32 %v1522_v17, %v273_v22  ;;  %v288_v30 = vrot.slane %v287_v24, 2 }
  0x9b   :  { %1305 = vst.msk [vmem:[%s2594_s3 + $0x165] ss:$8 sm:$0x3] %vm1531_vm0, %v553_v19  ;;  %1321 = vst.msk [vmem:[%s2594_s3 + $0x166] ss:$8 sm:$0x3] %vm1531_vm0, %v553_v19 }
  0x9c   :  { %1337 = vst.msk [vmem:[%s2594_s3 + $0x167] ss:$8 sm:$0x3] %vm1531_vm0, %v553_v19  ;;  %1353 = vst.msk [vmem:[%s2594_s3 + $0x170] ss:$8 sm:$0x3] %vm1531_vm0, %v553_v19  ;;  %v283_v29 = vadd.f32 %v282_v23, %v281_v15  ;;  %v569_v34 = vcombine.low %v336_v27, %v337_v28  ;;  %v289_v36 = vadd.f32 %v288_v30, %v287_v24 }
  0x9d   :  { %1369 = vst.msk [vmem:[%s2594_s3 + $0x171] ss:$8 sm:$0x3] %vm1531_vm0, %v553_v19  ;;  %1385 = vst.msk [vmem:[%s2594_s3 + $0x172] ss:$8 sm:$0x3] %vm1531_vm0, %v553_v19 }
  0x9e   :  { %1401 = vst.msk [vmem:[%s2594_s3 + $0x173] ss:$8 sm:$0x3] %vm1531_vm0, %v553_v19  ;;  %v278_v32 = vrot.slane %v277_v25, 1  ;;  %v294_v33 = vrot.slane %v293_v26, 2  ;;  %v284_v35 = vrot.slane %v283_v29, 1  ;;  %v576_v40 = vrot.slane %v569_v34, %v1517_v13 }
  0x9f   :  { %v290_v42 = vrot.slane %v289_v36, 1  ;;  %1226 = vst.msk [vmem:[%s2594_s3 + $0x180] ss:$8 sm:$0x3] %vm1531_vm0, %v568_v37 }
  0xa0   :  { %v279_v38 = vadd.f32 %v278_v32, %v277_v25  ;;  %v295_v39 = vadd.f32 %v294_v33, %v293_v26  ;;  %v285_v41 = vadd.f32 %v284_v35, %v283_v29  ;;  %1242 = vst.msk [vmem:[%s2594_s3 + $0x181] ss:$8 sm:$0x3] %vm1531_vm0, %v568_v37  ;;  %1258 = vst.msk [vmem:[%s2594_s3 + $0x182] ss:$8 sm:$0x3] %vm1531_vm0, %v568_v37 }
  0xa1   :  { %1274 = vst.msk [vmem:[%s2594_s3 + $0x183] ss:$8 sm:$0x3] %vm1531_vm0, %v568_v37  ;;  %1290 = vst.msk [vmem:[%s2594_s3 + $0x184] ss:$8 sm:$0x3] %vm1531_vm0, %v568_v37  ;;  %v583_v45 = vrot.slane %v576_v40, %v1517_v13  ;;  %v291_v47 = vadd.f32 %v290_v42, %v289_v36 }
  0xa2   :  { %1306 = vst.msk [vmem:[%s2594_s3 + $0x185] ss:$8 sm:$0x3] %vm1531_vm0, %v568_v37  ;;  %1322 = vst.msk [vmem:[%s2594_s3 + $0x186] ss:$8 sm:$0x3] %vm1531_vm0, %v568_v37  ;;  %v338_v43 = vadd.f32 %v1520_v16, %v279_v38  ;;  %v339_v46 = vadd.f32 %v1522_v17, %v285_v41 }
  0xa3   :  { %1338 = vst.msk [vmem:[%s2594_s3 + $0x187] ss:$8 sm:$0x3] %vm1531_vm0, %v568_v37  ;;  %1354 = vst.msk [vmem:[%s2594_s3 + $0x190] ss:$8 sm:$0x3] %vm1531_vm0, %v568_v37  ;;  %v340_v50 = vadd.f32 %v1520_v16, %v291_v47 }
  0xa4   :  { %1370 = vst.msk [vmem:[%s2594_s3 + $0x191] ss:$8 sm:$0x3] %vm1531_vm0, %v568_v37  ;;  %1386 = vst.msk [vmem:[%s2594_s3 + $0x192] ss:$8 sm:$0x3] %vm1531_vm0, %v568_v37  ;;  %v584_v49 = vcombine.low %v338_v43, %v339_v46 }
  0xa5   :  { %1402 = vst.msk [vmem:[%s2594_s3 + $0x193] ss:$8 sm:$0x3] %vm1531_vm0, %v568_v37  ;;  %v296_v44 = vrot.slane %v295_v39, 1 }
  0xa6   :  { %1227 = vst.msk [vmem:[%s2594_s3 + $0x1a0] ss:$8 sm:$0x3] %vm1531_vm0, %v583_v45  ;;  %1243 = vst.msk [vmem:[%s2594_s3 + $0x1a1] ss:$8 sm:$0x3] %vm1531_vm0, %v583_v45  ;;  %v591_v52 = vrot.slane %v584_v49, %v1517_v13 }
  0xa7   :  { %v297_v48 = vadd.f32 %v296_v44, %v295_v39  ;;  %1259 = vst.msk [vmem:[%s2594_s3 + $0x1a2] ss:$8 sm:$0x3] %vm1531_vm0, %v583_v45  ;;  %1275 = vst.msk [vmem:[%s2594_s3 + $0x1a3] ss:$8 sm:$0x3] %vm1531_vm0, %v583_v45 }
  0xa8   :  { %1291 = vst.msk [vmem:[%s2594_s3 + $0x1a4] ss:$8 sm:$0x3] %vm1531_vm0, %v583_v45  ;;  %1307 = vst.msk [vmem:[%s2594_s3 + $0x1a5] ss:$8 sm:$0x3] %vm1531_vm0, %v583_v45  ;;  %v598_v54 = vrot.slane %v591_v52, %v1517_v13 }
  0xa9   :  { %1323 = vst.msk [vmem:[%s2594_s3 + $0x1a6] ss:$8 sm:$0x3] %vm1531_vm0, %v583_v45  ;;  %1339 = vst.msk [vmem:[%s2594_s3 + $0x1a7] ss:$8 sm:$0x3] %vm1531_vm0, %v583_v45  ;;  %v341_v51 = vadd.f32 %v1522_v17, %v297_v48 }
  0xaa   :  { %1355 = vst.msk [vmem:[%s2594_s3 + $0x1b0] ss:$8 sm:$0x3] %vm1531_vm0, %v583_v45  ;;  %1371 = vst.msk [vmem:[%s2594_s3 + $0x1b1] ss:$8 sm:$0x3] %vm1531_vm0, %v583_v45 }
  0xab   :  { %1387 = vst.msk [vmem:[%s2594_s3 + $0x1b2] ss:$8 sm:$0x3] %vm1531_vm0, %v583_v45  ;;  %1403 = vst.msk [vmem:[%s2594_s3 + $0x1b3] ss:$8 sm:$0x3] %vm1531_vm0, %v583_v45  ;;  %v599_v53 = vcombine.low %v340_v50, %v341_v51 }
  0xac   :  { %1228 = vst.msk [vmem:[%s2594_s3 + $0x1c0] ss:$8 sm:$0x3] %vm1531_vm0, %v598_v54  ;;  %1244 = vst.msk [vmem:[%s2594_s3 + $0x1c1] ss:$8 sm:$0x3] %vm1531_vm0, %v598_v54 }
  0xad   :  { %v606_v55 = vrot.slane %v599_v53, %v1517_v13  ;;  %1260 = vst.msk [vmem:[%s2594_s3 + $0x1c2] ss:$8 sm:$0x3] %vm1531_vm0, %v598_v54  ;;  %1276 = vst.msk [vmem:[%s2594_s3 + $0x1c3] ss:$8 sm:$0x3] %vm1531_vm0, %v598_v54 }
  0xae   :  { %1292 = vst.msk [vmem:[%s2594_s3 + $0x1c4] ss:$8 sm:$0x3] %vm1531_vm0, %v598_v54  ;;  %1308 = vst.msk [vmem:[%s2594_s3 + $0x1c5] ss:$8 sm:$0x3] %vm1531_vm0, %v598_v54 }
  0xaf   :  { %1324 = vst.msk [vmem:[%s2594_s3 + $0x1c6] ss:$8 sm:$0x3] %vm1531_vm0, %v598_v54  ;;  %1340 = vst.msk [vmem:[%s2594_s3 + $0x1c7] ss:$8 sm:$0x3] %vm1531_vm0, %v598_v54  ;;  %v613_v16 = vrot.slane %v606_v55, %v1517_v13 }
  0xb0   :  { %1356 = vst.msk [vmem:[%s2594_s3 + $0x1d0] ss:$8 sm:$0x3] %vm1531_vm0, %v598_v54  ;;  %1372 = vst.msk [vmem:[%s2594_s3 + $0x1d1] ss:$8 sm:$0x3] %vm1531_vm0, %v598_v54 }
  0xb1   :  { %1388 = vst.msk [vmem:[%s2594_s3 + $0x1d2] ss:$8 sm:$0x3] %vm1531_vm0, %v598_v54  ;;  %1404 = vst.msk [vmem:[%s2594_s3 + $0x1d3] ss:$8 sm:$0x3] %vm1531_vm0, %v598_v54 }
  0xb2   :  { %1229 = vst.msk [vmem:[%s2594_s3 + $0x1e0] ss:$8 sm:$0x3] %vm1531_vm0, %v613_v16  ;;  %1245 = vst.msk [vmem:[%s2594_s3 + $0x1e1] ss:$8 sm:$0x3] %vm1531_vm0, %v613_v16 }
  0xb3   :  { %1261 = vst.msk [vmem:[%s2594_s3 + $0x1e2] ss:$8 sm:$0x3] %vm1531_vm0, %v613_v16  ;;  %1277 = vst.msk [vmem:[%s2594_s3 + $0x1e3] ss:$8 sm:$0x3] %vm1531_vm0, %v613_v16 }
  0xb4   :  { %1293 = vst.msk [vmem:[%s2594_s3 + $0x1e4] ss:$8 sm:$0x3] %vm1531_vm0, %v613_v16  ;;  %1309 = vst.msk [vmem:[%s2594_s3 + $0x1e5] ss:$8 sm:$0x3] %vm1531_vm0, %v613_v16 }
  0xb5   :  { %1325 = vst.msk [vmem:[%s2594_s3 + $0x1e6] ss:$8 sm:$0x3] %vm1531_vm0, %v613_v16  ;;  %1341 = vst.msk [vmem:[%s2594_s3 + $0x1e7] ss:$8 sm:$0x3] %vm1531_vm0, %v613_v16 }
  0xb6   :  { %1357 = vst.msk [vmem:[%s2594_s3 + $0x1f0] ss:$8 sm:$0x3] %vm1531_vm0, %v613_v16  ;;  %1373 = vst.msk [vmem:[%s2594_s3 + $0x1f1] ss:$8 sm:$0x3] %vm1531_vm0, %v613_v16 }
  0xb7   :  { %1389 = vst.msk [vmem:[%s2594_s3 + $0x1f2] ss:$8 sm:$0x3] %vm1531_vm0, %v613_v16  ;;  %1405 = vst.msk [vmem:[%s2594_s3 + $0x1f3] ss:$8 sm:$0x3] %vm1531_vm0, %v613_v16 }
  0xb8   :  { %1213 = vsyncpa [#allocation3], 1 }
  0xb9   :  { %1214 = vsyncpa [#allocation5], 1 }

</bundles_post_ra>
